<compile_context>
chip_gen: v7x
topology: tpu7x:2x2x1
jax: 0.10.0
libtpu: 0.0.40
codegen_flags: <defaults>
</compile_context>

<pallas_src>
import functools

import jax
import jax.numpy as jnp
from jax.experimental import pallas as pl
from jax.experimental.pallas import tpu as pltpu


def _round_up(n, m):
    return -(-n // m) * m


def make_fused_rnn_kernel(num_layers, T, B, H):
    """Fused kernel: num_layers tanh-RNN layers + final Linear.

    Positional refs:
      x_ref                        (T, B, H)  padded time-major input
      [w_ih_t, w_hh_t, bias] * L   (H, H), (H, H), (1, H)  pre-transposed/padded
      w_fc_t                       (H, C)
      b_fc                         (1, C)
      out_ref                      (B, C)
      seq_ref (VMEM scratch)       (T, B, H)  inter-layer sequence
    """

    def kernel(*refs):
        x_ref = refs[0]
        w_refs = refs[1:1 + 3 * num_layers]
        w_fc_ref = refs[1 + 3 * num_layers]
        b_fc_ref = refs[2 + 3 * num_layers]
        out_ref = refs[3 + 3 * num_layers]
        seq_ref = refs[4 + 3 * num_layers]

        h = None
        for l in range(num_layers):
            w_ih_t = w_refs[3 * l][...]      # (H, H)  = W_ih^T, zero-padded
            w_hh_t = w_refs[3 * l + 1][...]  # (H, H)  = W_hh^T, zero-padded
            bias = w_refs[3 * l + 2][...]    # (1, H)  = b_ih + b_hh, padded

            # Hoisted input projection: one MXU matmul for all T timesteps
            # instead of T tiny matmuls on the serial critical path.
            src = x_ref if l == 0 else seq_ref
            prev = src[...].reshape(T * B, H)
            xw = jnp.dot(prev, w_ih_t, preferred_element_type=jnp.float32) + bias
            seq_ref[...] = xw.reshape(T, B, H)

            # Serial recurrence, fully unrolled (T is small and static).
            h = jnp.zeros((B, H), jnp.float32)
            for t in range(T):
                h = jnp.tanh(
                    seq_ref[t]
                    + jnp.dot(h, w_hh_t, preferred_element_type=jnp.float32)
                )
                if l < num_layers - 1:
                    # Only non-top layers need their full output sequence.
                    seq_ref[t] = h

        # Final Linear on the last timestep's hidden state of the top layer.
        out_ref[...] = (
            jnp.dot(h, w_fc_ref[...], preferred_element_type=jnp.float32)
            + b_fc_ref[...]
        ).astype(out_ref.dtype)

    return kernel


def _vmem_spec():
    return pl.BlockSpec(memory_space=pltpu.MemorySpace.VMEM)


def rnn_forward(x, params, *, num_layers, hidden_size, num_classes):
    """Mirrors RNN.forward(x) of the PyTorch module."""
    B, D, T = x.shape[0], x.shape[1], x.shape[2]

    # Padded, lane/sublane-dense sizes.  H_pad doubles as the padded input
    # feature dim so one scratch buffer shape serves every layer.
    H_pad = _round_up(max(hidden_size, D), 128)
    C_pad = _round_up(num_classes, 128)
    B_pad = _round_up(B, 8)

    # torch.reshape(x, (B, seq_len, input_size)) -- pure reshape semantics.
    x_btd = jnp.reshape(x, (B, T, D)).astype(jnp.float32)
    seq = jnp.transpose(x_btd, (1, 0, 2))                      # (T, B, D)
    seq = jnp.pad(seq, ((0, 0), (0, B_pad - B), (0, H_pad - D)))

    args = [seq]
    for l in range(num_layers):
        w_ih, w_hh, b_ih, b_hh = params[f"l{l}"]
        d_in = w_ih.shape[1]
        w_ih_t = jnp.pad(
            w_ih.T.astype(jnp.float32),
            ((0, H_pad - d_in), (0, H_pad - hidden_size)))
        w_hh_t = jnp.pad(
            w_hh.T.astype(jnp.float32),
            ((0, H_pad - hidden_size), (0, H_pad - hidden_size)))
        bias = jnp.pad(
            (b_ih + b_hh).astype(jnp.float32).reshape(1, hidden_size),
            ((0, 0), (0, H_pad - hidden_size)))
        args += [w_ih_t, w_hh_t, bias]

    w_fc, b_fc = params["fc"]
    w_fc_t = jnp.pad(
        w_fc.T.astype(jnp.float32),
        ((0, H_pad - hidden_size), (0, C_pad - num_classes)))
    b_fc_p = jnp.pad(
        b_fc.astype(jnp.float32).reshape(1, num_classes),
        ((0, 0), (0, C_pad - num_classes)))
    args += [w_fc_t, b_fc_p]

    kernel = make_fused_rnn_kernel(num_layers, T, B_pad, H_pad)
    out_pad = pl.pallas_call(
        kernel,
        out_shape=jax.ShapeDtypeStruct((B_pad, C_pad), jnp.float32),
        in_specs=[_vmem_spec() for _ in args],
        out_specs=_vmem_spec(),
        scratch_shapes=[pltpu.VMEM((T, B_pad, H_pad), jnp.float32)],
    )(*args)

    # Strip batch / class padding (free on the XLA side).
    return out_pad[:B, :num_classes]


def rnn_reference(x, params, *, num_layers, hidden_size, num_classes):
    """Pure-JAX reference matching nn.RNN(batch_first=True) + nn.Linear."""
    B, D, T = x.shape[0], x.shape[1], x.shape[2]
    inp = jnp.reshape(x, (B, T, D)).astype(jnp.float32)
    for l in range(num_layers):
        w_ih, w_hh, b_ih, b_hh = params[f"l{l}"]
        h = jnp.zeros((B, hidden_size), jnp.float32)
        outs = []
        for t in range(T):
            h = jnp.tanh(inp[:, t] @ w_ih.T + b_ih + h @ w_hh.T + b_hh)
            outs.append(h)
        inp = jnp.stack(outs, axis=1)
    last = inp[:, -1]
    w_fc, b_fc = params["fc"]
    return last @ w_fc.T + b_fc


def init_params(key, input_size, hidden_size, num_layers, num_classes):
    """Deterministic init following PyTorch's U(-1/sqrt(H), 1/sqrt(H))."""
    params = {}
    k = 1.0 / jnp.sqrt(jnp.float32(hidden_size))
    for l in range(num_layers):
        in_dim = input_size if l == 0 else hidden_size
        key, k1, k2, k3, k4 = jax.random.split(key, 5)
        params[f"l{l}"] = (
            jax.random.uniform(k1, (hidden_size, in_dim), jnp.float32, -k, k),
            jax.random.uniform(k2, (hidden_size, hidden_size), jnp.float32, -k, k),
            jax.random.uniform(k3, (hidden_size,), jnp.float32, -k, k),
            jax.random.uniform(k4, (hidden_size,), jnp.float32, -k, k),
        )
    key, k1, k2 = jax.random.split(key, 3)
    kf = 1.0 / jnp.sqrt(jnp.float32(hidden_size))
    params["fc"] = (
        jax.random.uniform(k1, (num_classes, hidden_size), jnp.float32, -kf, kf),
        jax.random.uniform(k2, (num_classes,), jnp.float32, -kf, kf),
    )
    return params


if __name__ == "__main__":
    # Small shapes consistent with the module's forward.
    batch = 2
    input_size = 4      # x.shape[1]
    seq_len = 8         # x.shape[2]
    hidden_size = 32
    num_layers = 2
    num_classes = 10

    key = jax.random.PRNGKey(0)
    key, kx, kp = jax.random.split(key, 3)
    x = jax.random.normal(kx, (batch, input_size, seq_len), jnp.float32)
    params = init_params(kp, input_size, hidden_size, num_layers, num_classes)

    fwd = jax.jit(functools.partial(
        rnn_forward,
        num_layers=num_layers,
        hidden_size=hidden_size,
        num_classes=num_classes,
    ))
    out = jax.block_until_ready(fwd(x, params))

    ref = rnn_reference(
        x, params,
        num_layers=num_layers,
        hidden_size=hidden_size,
        num_classes=num_classes,
    )
    assert out.shape == (batch, num_classes)
    assert jnp.allclose(out, ref, atol=1e-5, rtol=1e-5), (out, ref)
    print("KERNEL_OK")
</pallas_src>

<mosaic_0001>
module attributes {stable_mosaic.version = 11 : i64} {
  func.func @kernel(%arg0: memref<8x8x128xf32, #tpu.memory_space<vmem>>, %arg1: memref<128x128xf32, #tpu.memory_space<vmem>>, %arg2: memref<128x128xf32, #tpu.memory_space<vmem>>, %arg3: memref<1x128xf32, #tpu.memory_space<vmem>>, %arg4: memref<128x128xf32, #tpu.memory_space<vmem>>, %arg5: memref<128x128xf32, #tpu.memory_space<vmem>>, %arg6: memref<1x128xf32, #tpu.memory_space<vmem>>, %arg7: memref<128x128xf32, #tpu.memory_space<vmem>>, %arg8: memref<1x128xf32, #tpu.memory_space<vmem>>, %arg9: memref<8x128xf32, #tpu.memory_space<vmem>>, %arg10: memref<8x8x128xf32, #tpu.memory_space<vmem>>) attributes {dimension_semantics = [], scalar_prefetch = 0 : i64, scratch_operands = 1 : i64, tpu.core_type = #tpu.core_type<tc>} {
    %c0 = arith.constant 0 : index
    %c0_0 = arith.constant 0 : index
    %0 = vector.load %arg1[%c0, %c0_0] : memref<128x128xf32, #tpu.memory_space<vmem>>, vector<128x128xf32>
    %c0_1 = arith.constant 0 : index
    %c0_2 = arith.constant 0 : index
    %1 = vector.load %arg2[%c0_1, %c0_2] : memref<128x128xf32, #tpu.memory_space<vmem>>, vector<128x128xf32>
    %c0_3 = arith.constant 0 : index
    %c0_4 = arith.constant 0 : index
    %2 = vector.load %arg3[%c0_3, %c0_4] : memref<1x128xf32, #tpu.memory_space<vmem>>, vector<1x128xf32>
    %c0_5 = arith.constant 0 : index
    %c0_6 = arith.constant 0 : index
    %c0_7 = arith.constant 0 : index
    %3 = vector.load %arg0[%c0_5, %c0_6, %c0_7] : memref<8x8x128xf32, #tpu.memory_space<vmem>>, vector<8x8x128xf32>
    %4 = vector.shape_cast %3 : vector<8x8x128xf32> to vector<64x128xf32>
    %cst = arith.constant dense<0.000000e+00> : vector<64x128xf32>
    %5 = tpu.matmul %4, %0, %cst {dimension_numbers = #tpu.dot_dimension_numbers<[1], [0], [0], [1], [0, 0, 1, 1], [], []>} : vector<64x128xf32>, vector<128x128xf32>, vector<64x128xf32> -> vector<64x128xf32>
    %6 = vector.broadcast %2 : vector<1x128xf32> to vector<64x128xf32>
    %7 = arith.addf %5, %6 : vector<64x128xf32>
    %8 = vector.shape_cast %7 : vector<64x128xf32> to vector<8x8x128xf32>
    %c0_8 = arith.constant 0 : index
    %c0_9 = arith.constant 0 : index
    %c0_10 = arith.constant 0 : index
    %9 = vector.load %arg10[%c0_8, %c0_9, %c0_10] : memref<8x8x128xf32, #tpu.memory_space<vmem>>, vector<8x8x128xf32>
    tpu.vector_store %arg10[%c0_8, %c0_9, %c0_10], %8 {strides = array<i32>} : memref<8x8x128xf32, #tpu.memory_space<vmem>>, vector<8x8x128xf32>,
    %cst_11 = arith.constant 0.000000e+00 : f32
    %10 = vector.broadcast %cst_11 : f32 to vector<8x128xf32>
    %c0_12 = arith.constant 0 : index
    %c0_13 = arith.constant 0 : index
    %c0_14 = arith.constant 0 : index
    %11 = vector.load %arg10[%c0_12, %c0_13, %c0_14] : memref<8x8x128xf32, #tpu.memory_space<vmem>>, vector<1x8x128xf32>
    %12 = vector.shape_cast %11 : vector<1x8x128xf32> to vector<8x128xf32>
    %cst_15 = arith.constant dense<0.000000e+00> : vector<8x128xf32>
    %13 = tpu.matmul %10, %1, %cst_15 {dimension_numbers = #tpu.dot_dimension_numbers<[1], [0], [0], [1], [0, 0, 1, 1], [], []>} : vector<8x128xf32>, vector<128x128xf32>, vector<8x128xf32> -> vector<8x128xf32>
    %14 = arith.addf %12, %13 : vector<8x128xf32>
    %15 = math.tanh %14 : vector<8x128xf32>
    %c0_16 = arith.constant 0 : index
    %c0_17 = arith.constant 0 : index
    %c0_18 = arith.constant 0 : index
    %16 = vector.load %arg10[%c0_16, %c0_17, %c0_18] : memref<8x8x128xf32, #tpu.memory_space<vmem>>, vector<1x8x128xf32>
    %17 = vector.shape_cast %16 : vector<1x8x128xf32> to vector<8x128xf32>
    %18 = vector.shape_cast %15 : vector<8x128xf32> to vector<1x8x128xf32>
    tpu.vector_store %arg10[%c0_16, %c0_17, %c0_18], %18 {strides = array<i32>} : memref<8x8x128xf32, #tpu.memory_space<vmem>>, vector<1x8x128xf32>,
    %c1 = arith.constant 1 : index
    %c0_19 = arith.constant 0 : index
    %c0_20 = arith.constant 0 : index
    %19 = vector.load %arg10[%c1, %c0_19, %c0_20] : memref<8x8x128xf32, #tpu.memory_space<vmem>>, vector<1x8x128xf32>
    %20 = vector.shape_cast %19 : vector<1x8x128xf32> to vector<8x128xf32>
    %cst_21 = arith.constant dense<0.000000e+00> : vector<8x128xf32>
    %21 = tpu.matmul %15, %1, %cst_21 {dimension_numbers = #tpu.dot_dimension_numbers<[1], [0], [0], [1], [0, 0, 1, 1], [], []>} : vector<8x128xf32>, vector<128x128xf32>, vector<8x128xf32> -> vector<8x128xf32>
    %22 = arith.addf %20, %21 : vector<8x128xf32>
    %23 = math.tanh %22 : vector<8x128xf32>
    %c1_22 = arith.constant 1 : index
    %c0_23 = arith.constant 0 : index
    %c0_24 = arith.constant 0 : index
    %24 = vector.load %arg10[%c1_22, %c0_23, %c0_24] : memref<8x8x128xf32, #tpu.memory_space<vmem>>, vector<1x8x128xf32>
    %25 = vector.shape_cast %24 : vector<1x8x128xf32> to vector<8x128xf32>
    %26 = vector.shape_cast %23 : vector<8x128xf32> to vector<1x8x128xf32>
    tpu.vector_store %arg10[%c1_22, %c0_23, %c0_24], %26 {strides = array<i32>} : memref<8x8x128xf32, #tpu.memory_space<vmem>>, vector<1x8x128xf32>,
    %c2 = arith.constant 2 : index
    %c0_25 = arith.constant 0 : index
    %c0_26 = arith.constant 0 : index
    %27 = vector.load %arg10[%c2, %c0_25, %c0_26] : memref<8x8x128xf32, #tpu.memory_space<vmem>>, vector<1x8x128xf32>
    %28 = vector.shape_cast %27 : vector<1x8x128xf32> to vector<8x128xf32>
    %cst_27 = arith.constant dense<0.000000e+00> : vector<8x128xf32>
    %29 = tpu.matmul %23, %1, %cst_27 {dimension_numbers = #tpu.dot_dimension_numbers<[1], [0], [0], [1], [0, 0, 1, 1], [], []>} : vector<8x128xf32>, vector<128x128xf32>, vector<8x128xf32> -> vector<8x128xf32>
    %30 = arith.addf %28, %29 : vector<8x128xf32>
    %31 = math.tanh %30 : vector<8x128xf32>
    %c2_28 = arith.constant 2 : index
    %c0_29 = arith.constant 0 : index
    %c0_30 = arith.constant 0 : index
    %32 = vector.load %arg10[%c2_28, %c0_29, %c0_30] : memref<8x8x128xf32, #tpu.memory_space<vmem>>, vector<1x8x128xf32>
    %33 = vector.shape_cast %32 : vector<1x8x128xf32> to vector<8x128xf32>
    %34 = vector.shape_cast %31 : vector<8x128xf32> to vector<1x8x128xf32>
    tpu.vector_store %arg10[%c2_28, %c0_29, %c0_30], %34 {strides = array<i32>} : memref<8x8x128xf32, #tpu.memory_space<vmem>>, vector<1x8x128xf32>,
    %c3 = arith.constant 3 : index
    %c0_31 = arith.constant 0 : index
    %c0_32 = arith.constant 0 : index
    %35 = vector.load %arg10[%c3, %c0_31, %c0_32] : memref<8x8x128xf32, #tpu.memory_space<vmem>>, vector<1x8x128xf32>
    %36 = vector.shape_cast %35 : vector<1x8x128xf32> to vector<8x128xf32>
    %cst_33 = arith.constant dense<0.000000e+00> : vector<8x128xf32>
    %37 = tpu.matmul %31, %1, %cst_33 {dimension_numbers = #tpu.dot_dimension_numbers<[1], [0], [0], [1], [0, 0, 1, 1], [], []>} : vector<8x128xf32>, vector<128x128xf32>, vector<8x128xf32> -> vector<8x128xf32>
    %38 = arith.addf %36, %37 : vector<8x128xf32>
    %39 = math.tanh %38 : vector<8x128xf32>
    %c3_34 = arith.constant 3 : index
    %c0_35 = arith.constant 0 : index
    %c0_36 = arith.constant 0 : index
    %40 = vector.load %arg10[%c3_34, %c0_35, %c0_36] : memref<8x8x128xf32, #tpu.memory_space<vmem>>, vector<1x8x128xf32>
    %41 = vector.shape_cast %40 : vector<1x8x128xf32> to vector<8x128xf32>
    %42 = vector.shape_cast %39 : vector<8x128xf32> to vector<1x8x128xf32>
    tpu.vector_store %arg10[%c3_34, %c0_35, %c0_36], %42 {strides = array<i32>} : memref<8x8x128xf32, #tpu.memory_space<vmem>>, vector<1x8x128xf32>,
    %c4 = arith.constant 4 : index
    %c0_37 = arith.constant 0 : index
    %c0_38 = arith.constant 0 : index
    %43 = vector.load %arg10[%c4, %c0_37, %c0_38] : memref<8x8x128xf32, #tpu.memory_space<vmem>>, vector<1x8x128xf32>
    %44 = vector.shape_cast %43 : vector<1x8x128xf32> to vector<8x128xf32>
    %cst_39 = arith.constant dense<0.000000e+00> : vector<8x128xf32>
    %45 = tpu.matmul %39, %1, %cst_39 {dimension_numbers = #tpu.dot_dimension_numbers<[1], [0], [0], [1], [0, 0, 1, 1], [], []>} : vector<8x128xf32>, vector<128x128xf32>, vector<8x128xf32> -> vector<8x128xf32>
    %46 = arith.addf %44, %45 : vector<8x128xf32>
    %47 = math.tanh %46 : vector<8x128xf32>
    %c4_40 = arith.constant 4 : index
    %c0_41 = arith.constant 0 : index
    %c0_42 = arith.constant 0 : index
    %48 = vector.load %arg10[%c4_40, %c0_41, %c0_42] : memref<8x8x128xf32, #tpu.memory_space<vmem>>, vector<1x8x128xf32>
    %49 = vector.shape_cast %48 : vector<1x8x128xf32> to vector<8x128xf32>
    %50 = vector.shape_cast %47 : vector<8x128xf32> to vector<1x8x128xf32>
    tpu.vector_store %arg10[%c4_40, %c0_41, %c0_42], %50 {strides = array<i32>} : memref<8x8x128xf32, #tpu.memory_space<vmem>>, vector<1x8x128xf32>,
    %c5 = arith.constant 5 : index
    %c0_43 = arith.constant 0 : index
    %c0_44 = arith.constant 0 : index
    %51 = vector.load %arg10[%c5, %c0_43, %c0_44] : memref<8x8x128xf32, #tpu.memory_space<vmem>>, vector<1x8x128xf32>
    %52 = vector.shape_cast %51 : vector<1x8x128xf32> to vector<8x128xf32>
    %cst_45 = arith.constant dense<0.000000e+00> : vector<8x128xf32>
    %53 = tpu.matmul %47, %1, %cst_45 {dimension_numbers = #tpu.dot_dimension_numbers<[1], [0], [0], [1], [0, 0, 1, 1], [], []>} : vector<8x128xf32>, vector<128x128xf32>, vector<8x128xf32> -> vector<8x128xf32>
    %54 = arith.addf %52, %53 : vector<8x128xf32>
    %55 = math.tanh %54 : vector<8x128xf32>
    %c5_46 = arith.constant 5 : index
    %c0_47 = arith.constant 0 : index
    %c0_48 = arith.constant 0 : index
    %56 = vector.load %arg10[%c5_46, %c0_47, %c0_48] : memref<8x8x128xf32, #tpu.memory_space<vmem>>, vector<1x8x128xf32>
    %57 = vector.shape_cast %56 : vector<1x8x128xf32> to vector<8x128xf32>
    %58 = vector.shape_cast %55 : vector<8x128xf32> to vector<1x8x128xf32>
    tpu.vector_store %arg10[%c5_46, %c0_47, %c0_48], %58 {strides = array<i32>} : memref<8x8x128xf32, #tpu.memory_space<vmem>>, vector<1x8x128xf32>,
    %c6 = arith.constant 6 : index
    %c0_49 = arith.constant 0 : index
    %c0_50 = arith.constant 0 : index
    %59 = vector.load %arg10[%c6, %c0_49, %c0_50] : memref<8x8x128xf32, #tpu.memory_space<vmem>>, vector<1x8x128xf32>
    %60 = vector.shape_cast %59 : vector<1x8x128xf32> to vector<8x128xf32>
    %cst_51 = arith.constant dense<0.000000e+00> : vector<8x128xf32>
    %61 = tpu.matmul %55, %1, %cst_51 {dimension_numbers = #tpu.dot_dimension_numbers<[1], [0], [0], [1], [0, 0, 1, 1], [], []>} : vector<8x128xf32>, vector<128x128xf32>, vector<8x128xf32> -> vector<8x128xf32>
    %62 = arith.addf %60, %61 : vector<8x128xf32>
    %63 = math.tanh %62 : vector<8x128xf32>
    %c6_52 = arith.constant 6 : index
    %c0_53 = arith.constant 0 : index
    %c0_54 = arith.constant 0 : index
    %64 = vector.load %arg10[%c6_52, %c0_53, %c0_54] : memref<8x8x128xf32, #tpu.memory_space<vmem>>, vector<1x8x128xf32>
    %65 = vector.shape_cast %64 : vector<1x8x128xf32> to vector<8x128xf32>
    %66 = vector.shape_cast %63 : vector<8x128xf32> to vector<1x8x128xf32>
    tpu.vector_store %arg10[%c6_52, %c0_53, %c0_54], %66 {strides = array<i32>} : memref<8x8x128xf32, #tpu.memory_space<vmem>>, vector<1x8x128xf32>,
    %c7 = arith.constant 7 : index
    %c0_55 = arith.constant 0 : index
    %c0_56 = arith.constant 0 : index
    %67 = vector.load %arg10[%c7, %c0_55, %c0_56] : memref<8x8x128xf32, #tpu.memory_space<vmem>>, vector<1x8x128xf32>
    %68 = vector.shape_cast %67 : vector<1x8x128xf32> to vector<8x128xf32>
    %cst_57 = arith.constant dense<0.000000e+00> : vector<8x128xf32>
    %69 = tpu.matmul %63, %1, %cst_57 {dimension_numbers = #tpu.dot_dimension_numbers<[1], [0], [0], [1], [0, 0, 1, 1], [], []>} : vector<8x128xf32>, vector<128x128xf32>, vector<8x128xf32> -> vector<8x128xf32>
    %70 = arith.addf %68, %69 : vector<8x128xf32>
    %71 = math.tanh %70 : vector<8x128xf32>
    %c7_58 = arith.constant 7 : index
    %c0_59 = arith.constant 0 : index
    %c0_60 = arith.constant 0 : index
    %72 = vector.load %arg10[%c7_58, %c0_59, %c0_60] : memref<8x8x128xf32, #tpu.memory_space<vmem>>, vector<1x8x128xf32>
    %73 = vector.shape_cast %72 : vector<1x8x128xf32> to vector<8x128xf32>
    %74 = vector.shape_cast %71 : vector<8x128xf32> to vector<1x8x128xf32>
    tpu.vector_store %arg10[%c7_58, %c0_59, %c0_60], %74 {strides = array<i32>} : memref<8x8x128xf32, #tpu.memory_space<vmem>>, vector<1x8x128xf32>,
    %c0_61 = arith.constant 0 : index
    %c0_62 = arith.constant 0 : index
    %75 = vector.load %arg4[%c0_61, %c0_62] : memref<128x128xf32, #tpu.memory_space<vmem>>, vector<128x128xf32>
    %c0_63 = arith.constant 0 : index
    %c0_64 = arith.constant 0 : index
    %76 = vector.load %arg5[%c0_63, %c0_64] : memref<128x128xf32, #tpu.memory_space<vmem>>, vector<128x128xf32>
    %c0_65 = arith.constant 0 : index
    %c0_66 = arith.constant 0 : index
    %77 = vector.load %arg6[%c0_65, %c0_66] : memref<1x128xf32, #tpu.memory_space<vmem>>, vector<1x128xf32>
    %c0_67 = arith.constant 0 : index
    %c0_68 = arith.constant 0 : index
    %c0_69 = arith.constant 0 : index
    %78 = vector.load %arg10[%c0_67, %c0_68, %c0_69] : memref<8x8x128xf32, #tpu.memory_space<vmem>>, vector<8x8x128xf32>
    %79 = vector.shape_cast %78 : vector<8x8x128xf32> to vector<64x128xf32>
    %cst_70 = arith.constant dense<0.000000e+00> : vector<64x128xf32>
    %80 = tpu.matmul %79, %75, %cst_70 {dimension_numbers = #tpu.dot_dimension_numbers<[1], [0], [0], [1], [0, 0, 1, 1], [], []>} : vector<64x128xf32>, vector<128x128xf32>, vector<64x128xf32> -> vector<64x128xf32>
    %81 = vector.broadcast %77 : vector<1x128xf32> to vector<64x128xf32>
    %82 = arith.addf %80, %81 : vector<64x128xf32>
    %83 = vector.shape_cast %82 : vector<64x128xf32> to vector<8x8x128xf32>
    %c0_71 = arith.constant 0 : index
    %c0_72 = arith.constant 0 : index
    %c0_73 = arith.constant 0 : index
    %84 = vector.load %arg10[%c0_71, %c0_72, %c0_73] : memref<8x8x128xf32, #tpu.memory_space<vmem>>, vector<8x8x128xf32>
    tpu.vector_store %arg10[%c0_71, %c0_72, %c0_73], %83 {strides = array<i32>} : memref<8x8x128xf32, #tpu.memory_space<vmem>>, vector<8x8x128xf32>,
    %cst_74 = arith.constant 0.000000e+00 : f32
    %85 = vector.broadcast %cst_74 : f32 to vector<8x128xf32>
    %c0_75 = arith.constant 0 : index
    %c0_76 = arith.constant 0 : index
    %c0_77 = arith.constant 0 : index
    %86 = vector.load %arg10[%c0_75, %c0_76, %c0_77] : memref<8x8x128xf32, #tpu.memory_space<vmem>>, vector<1x8x128xf32>
    %87 = vector.shape_cast %86 : vector<1x8x128xf32> to vector<8x128xf32>
    %cst_78 = arith.constant dense<0.000000e+00> : vector<8x128xf32>
    %88 = tpu.matmul %85, %76, %cst_78 {dimension_numbers = #tpu.dot_dimension_numbers<[1], [0], [0], [1], [0, 0, 1, 1], [], []>} : vector<8x128xf32>, vector<128x128xf32>, vector<8x128xf32> -> vector<8x128xf32>
    %89 = arith.addf %87, %88 : vector<8x128xf32>
    %90 = math.tanh %89 : vector<8x128xf32>
    %c1_79 = arith.constant 1 : index
    %c0_80 = arith.constant 0 : index
    %c0_81 = arith.constant 0 : index
    %91 = vector.load %arg10[%c1_79, %c0_80, %c0_81] : memref<8x8x128xf32, #tpu.memory_space<vmem>>, vector<1x8x128xf32>
    %92 = vector.shape_cast %91 : vector<1x8x128xf32> to vector<8x128xf32>
    %cst_82 = arith.constant dense<0.000000e+00> : vector<8x128xf32>
    %93 = tpu.matmul %90, %76, %cst_82 {dimension_numbers = #tpu.dot_dimension_numbers<[1], [0], [0], [1], [0, 0, 1, 1], [], []>} : vector<8x128xf32>, vector<128x128xf32>, vector<8x128xf32> -> vector<8x128xf32>
    %94 = arith.addf %92, %93 : vector<8x128xf32>
    %95 = math.tanh %94 : vector<8x128xf32>
    %c2_83 = arith.constant 2 : index
    %c0_84 = arith.constant 0 : index
    %c0_85 = arith.constant 0 : index
    %96 = vector.load %arg10[%c2_83, %c0_84, %c0_85] : memref<8x8x128xf32, #tpu.memory_space<vmem>>, vector<1x8x128xf32>
    %97 = vector.shape_cast %96 : vector<1x8x128xf32> to vector<8x128xf32>
    %cst_86 = arith.constant dense<0.000000e+00> : vector<8x128xf32>
    %98 = tpu.matmul %95, %76, %cst_86 {dimension_numbers = #tpu.dot_dimension_numbers<[1], [0], [0], [1], [0, 0, 1, 1], [], []>} : vector<8x128xf32>, vector<128x128xf32>, vector<8x128xf32> -> vector<8x128xf32>
    %99 = arith.addf %97, %98 : vector<8x128xf32>
    %100 = math.tanh %99 : vector<8x128xf32>
    %c3_87 = arith.constant 3 : index
    %c0_88 = arith.constant 0 : index
    %c0_89 = arith.constant 0 : index
    %101 = vector.load %arg10[%c3_87, %c0_88, %c0_89] : memref<8x8x128xf32, #tpu.memory_space<vmem>>, vector<1x8x128xf32>
    %102 = vector.shape_cast %101 : vector<1x8x128xf32> to vector<8x128xf32>
    %cst_90 = arith.constant dense<0.000000e+00> : vector<8x128xf32>
    %103 = tpu.matmul %100, %76, %cst_90 {dimension_numbers = #tpu.dot_dimension_numbers<[1], [0], [0], [1], [0, 0, 1, 1], [], []>} : vector<8x128xf32>, vector<128x128xf32>, vector<8x128xf32> -> vector<8x128xf32>
    %104 = arith.addf %102, %103 : vector<8x128xf32>
    %105 = math.tanh %104 : vector<8x128xf32>
    %c4_91 = arith.constant 4 : index
    %c0_92 = arith.constant 0 : index
    %c0_93 = arith.constant 0 : index
    %106 = vector.load %arg10[%c4_91, %c0_92, %c0_93] : memref<8x8x128xf32, #tpu.memory_space<vmem>>, vector<1x8x128xf32>
    %107 = vector.shape_cast %106 : vector<1x8x128xf32> to vector<8x128xf32>
    %cst_94 = arith.constant dense<0.000000e+00> : vector<8x128xf32>
    %108 = tpu.matmul %105, %76, %cst_94 {dimension_numbers = #tpu.dot_dimension_numbers<[1], [0], [0], [1], [0, 0, 1, 1], [], []>} : vector<8x128xf32>, vector<128x128xf32>, vector<8x128xf32> -> vector<8x128xf32>
    %109 = arith.addf %107, %108 : vector<8x128xf32>
    %110 = math.tanh %109 : vector<8x128xf32>
    %c5_95 = arith.constant 5 : index
    %c0_96 = arith.constant 0 : index
    %c0_97 = arith.constant 0 : index
    %111 = vector.load %arg10[%c5_95, %c0_96, %c0_97] : memref<8x8x128xf32, #tpu.memory_space<vmem>>, vector<1x8x128xf32>
    %112 = vector.shape_cast %111 : vector<1x8x128xf32> to vector<8x128xf32>
    %cst_98 = arith.constant dense<0.000000e+00> : vector<8x128xf32>
    %113 = tpu.matmul %110, %76, %cst_98 {dimension_numbers = #tpu.dot_dimension_numbers<[1], [0], [0], [1], [0, 0, 1, 1], [], []>} : vector<8x128xf32>, vector<128x128xf32>, vector<8x128xf32> -> vector<8x128xf32>
    %114 = arith.addf %112, %113 : vector<8x128xf32>
    %115 = math.tanh %114 : vector<8x128xf32>
    %c6_99 = arith.constant 6 : index
    %c0_100 = arith.constant 0 : index
    %c0_101 = arith.constant 0 : index
    %116 = vector.load %arg10[%c6_99, %c0_100, %c0_101] : memref<8x8x128xf32, #tpu.memory_space<vmem>>, vector<1x8x128xf32>
    %117 = vector.shape_cast %116 : vector<1x8x128xf32> to vector<8x128xf32>
    %cst_102 = arith.constant dense<0.000000e+00> : vector<8x128xf32>
    %118 = tpu.matmul %115, %76, %cst_102 {dimension_numbers = #tpu.dot_dimension_numbers<[1], [0], [0], [1], [0, 0, 1, 1], [], []>} : vector<8x128xf32>, vector<128x128xf32>, vector<8x128xf32> -> vector<8x128xf32>
    %119 = arith.addf %117, %118 : vector<8x128xf32>
    %120 = math.tanh %119 : vector<8x128xf32>
    %c7_103 = arith.constant 7 : index
    %c0_104 = arith.constant 0 : index
    %c0_105 = arith.constant 0 : index
    %121 = vector.load %arg10[%c7_103, %c0_104, %c0_105] : memref<8x8x128xf32, #tpu.memory_space<vmem>>, vector<1x8x128xf32>
    %122 = vector.shape_cast %121 : vector<1x8x128xf32> to vector<8x128xf32>
    %cst_106 = arith.constant dense<0.000000e+00> : vector<8x128xf32>
    %123 = tpu.matmul %120, %76, %cst_106 {dimension_numbers = #tpu.dot_dimension_numbers<[1], [0], [0], [1], [0, 0, 1, 1], [], []>} : vector<8x128xf32>, vector<128x128xf32>, vector<8x128xf32> -> vector<8x128xf32>
    %124 = arith.addf %122, %123 : vector<8x128xf32>
    %125 = math.tanh %124 : vector<8x128xf32>
    %c0_107 = arith.constant 0 : index
    %c0_108 = arith.constant 0 : index
    %126 = vector.load %arg7[%c0_107, %c0_108] : memref<128x128xf32, #tpu.memory_space<vmem>>, vector<128x128xf32>
    %cst_109 = arith.constant dense<0.000000e+00> : vector<8x128xf32>
    %127 = tpu.matmul %125, %126, %cst_109 {dimension_numbers = #tpu.dot_dimension_numbers<[1], [0], [0], [1], [0, 0, 1, 1], [], []>} : vector<8x128xf32>, vector<128x128xf32>, vector<8x128xf32> -> vector<8x128xf32>
    %c0_110 = arith.constant 0 : index
    %c0_111 = arith.constant 0 : index
    %128 = vector.load %arg8[%c0_110, %c0_111] : memref<1x128xf32, #tpu.memory_space<vmem>>, vector<1x128xf32>
    %129 = vector.broadcast %128 : vector<1x128xf32> to vector<8x128xf32>
    %130 = arith.addf %127, %129 : vector<8x128xf32>
    %c0_112 = arith.constant 0 : index
    %c0_113 = arith.constant 0 : index
    %131 = vector.load %arg9[%c0_112, %c0_113] : memref<8x128xf32, #tpu.memory_space<vmem>>, vector<8x128xf32>
    tpu.vector_store %arg9[%c0_112, %c0_113], %130 {strides = array<i32>} : memref<8x128xf32, #tpu.memory_space<vmem>>, vector<8x128xf32>,
    return
  }
}

</mosaic_0001>

<bundles_post_ra>
// kernel: rnn_forward.1
= control target key start
LH: loop header
LB: loop body
LE: loop exit
PB: predicated region body
PF: predicated region fallthrough
CT: control target
= control target key end

     0   :  { %v3163_v2 = vmov 0.0|0.0   ;;  %vm3164_vm0 = vmmov 0   ;;  %v3165_v4 = vmov 0.0   ;;  %s3897_s1 = inlined_call_operand.vmem [shape: f32[128,128], index: 1, kind: input, shape index: {}]   ;;  %s3898_s2 = inlined_call_operand.vmem [shape: f32[128,128], index: 2, kind: input, shape index: {}]   ;;  %s3899_s0 = inlined_call_operand.vmem [shape: f32[8,8,128], index: 0, kind: input, shape index: {}]   ;;  %s3900_s3 = inlined_call_operand.vmem [shape: f32[1,128], index: 3, kind: input, shape index: {}]   ;;  %s3901_s4 = inlined_call_operand.vmem [shape: f32[128,128], index: 4, kind: input, shape index: {}]   ;;  %s3902_s5 = inlined_call_operand.vmem [shape: f32[128,128], index: 5, kind: input, shape index: {}]   ;;  %s3903_s6 = inlined_call_operand.vmem [shape: f32[1,128], index: 6, kind: input, shape index: {}]   ;;  %s3904_s7 = inlined_call_operand.vmem [shape: f32[128,128], index: 7, kind: input, shape index: {}]   ;;  %s3905_s8 = inlined_call_operand.vmem [shape: f32[1,128], index: 8, kind: input, shape index: {}]   ;;  %s3906_s9 = inlined_call_operand.vmem [shape: f32[8,128], index: 9, kind: output, shape index: {}]  }
   0x1   :  { %v32_v0 = vld [vmem:[%s3897_s1] sm:$0xff]  ;;  %v33_v1 = vld [vmem:[%s3897_s1 + $0x8] sm:$0xff]  ;;  %2688 = vmatprep.subr.bf16.mxu1 %v3163_v2  ;;  %2049 = vmatprep.mubr.msk.f32.mxu1 %vm3164_vm0, %v3165_v4  ;;  %v34_v7 = vld [vmem:[%s3897_s1 + $0x10] sm:$0xff] }
   0x2   :  { %v48_v3 = vld [vmem:[%s3898_s2] sm:$0xff]  ;;  %v2656_v5 = vpack.c.bf16 %v33_v1, %v32_v0  ;;  %v49_v6 = vld [vmem:[%s3898_s2 + $0x8] sm:$0xff]  ;;  %v35_v8 = vld [vmem:[%s3897_s1 + $0x18] sm:$0xff] }
   0x3   :  { %v3237_v9 = vpack.c.bf16 %v49_v6, %v48_v3  ;;  %v2660_v10 = vpack.c.bf16 %v35_v8, %v34_v7  ;;  %v50_v11 = vld [vmem:[%s3898_s2 + $0x10] sm:$0xff]  ;;  %v51_v12 = vld [vmem:[%s3898_s2 + $0x18] sm:$0xff]  ;;  %v36_v13 = vld [vmem:[%s3897_s1 + $0x20] sm:$0xff] }
   0x4   :  { %2657 = vmatprep.subr.bf16.mxu0 %v2656_v5  ;;  %v37_v14 = vld [vmem:[%s3897_s1 + $0x28] sm:$0xff]  ;;  %v3252_v15 = vpack.c.bf16 %v51_v12, %v50_v11  ;;  %v52_v17 = vld [vmem:[%s3898_s2 + $0x20] sm:$0xff]  ;;  %v38_v19 = vld [vmem:[%s3897_s1 + $0x30] sm:$0xff] }
   0x5   :  { %2659 = vmatpush3.bf16.msra.mxu0 %v2656_v5  ;;  %2690 = vmatpush3.bf16.msra.mxu1 %v3237_v9  ;;  %v2664_v16 = vpack.c.bf16 %v37_v14, %v36_v13  ;;  %v53_v18 = vld [vmem:[%s3898_s2 + $0x28] sm:$0xff]  ;;  %v39_v20 = vld [vmem:[%s3897_s1 + $0x38] sm:$0xff]  ;;  %v54_v23 = vld [vmem:[%s3898_s2 + $0x30] sm:$0xff] }
   0x6   :  { %2661 = vmatprep.subr.bf16.mxu0 %v2660_v10  ;;  %2691 = vmatprep.subr.bf16.mxu1 %v3163_v2  ;;  %v3268_v21 = vpack.c.bf16 %v53_v18, %v52_v17  ;;  %v2668_v22 = vpack.c.bf16 %v39_v20, %v38_v19  ;;  %v55_v24 = vld [vmem:[%s3898_s2 + $0x38] sm:$0xff]  ;;  %v40_v25 = vld [vmem:[%s3897_s1 + $0x40] sm:$0xff]  ;;  %v41_v26 = vld [vmem:[%s3897_s1 + $0x48] sm:$0xff] }
   0x7   :  { %v65_v27 = vld [vmem:[%s3899_s0] sm:$0xff]  ;;  %v3287_v28 = vpack.c.bf16 %v55_v24, %v54_v23  ;;  %v2672_v29 = vpack.c.bf16 %v41_v26, %v40_v25  ;;  %v57_v31 = vld [vmem:[%s3898_s2 + $0x48] sm:$0xff]  ;;  %v42_v32 = vld [vmem:[%s3897_s1 + $0x50] sm:$0xff] }
   0x8   :  { %2005 = vmatprep.mubr.f32.mxu0 %v65_v27  ;;  %v56_v30 = vld [vmem:[%s3898_s2 + $0x40] sm:$0xff]  ;;  %v43_v33 = vld [vmem:[%s3897_s1 + $0x58] sm:$0xff]  ;;  %v58_v36 = vld [vmem:[%s3898_s2 + $0x50] sm:$0xff] }
   0x9   :  { %2663 = vmatpush3.bf16.msra.mxu0 %v2660_v10  ;;  %2693 = vmatpush3.bf16.msra.mxu1 %v3252_v15  ;;  %v3303_v34 = vpack.c.bf16 %v57_v31, %v56_v30  ;;  %v2676_v35 = vpack.c.bf16 %v43_v33, %v42_v32  ;;  %v59_v37 = vld [vmem:[%s3898_s2 + $0x58] sm:$0xff]  ;;  %v44_v38 = vld [vmem:[%s3897_s1 + $0x60] sm:$0xff]  ;;  %v45_v39 = vld [vmem:[%s3897_s1 + $0x68] sm:$0xff] }
   0xa   :  { %2665 = vmatprep.subr.bf16.mxu0 %v2664_v16  ;;  %2694 = vmatprep.subr.bf16.mxu1 %v3163_v2  ;;  %v3319_v40 = vpack.c.bf16 %v59_v37, %v58_v36  ;;  %v2680_v41 = vpack.c.bf16 %v45_v39, %v44_v38  ;;  %v60_v42 = vld [vmem:[%s3898_s2 + $0x60] sm:$0xff]  ;;  %v61_v43 = vld [vmem:[%s3898_s2 + $0x68] sm:$0xff]  ;;  %v46_v44 = vld [vmem:[%s3897_s1 + $0x70] sm:$0xff] }
   0xb   :  { %v47_v45 = vld [vmem:[%s3897_s1 + $0x78] sm:$0xff]  ;;  %v3335_v46 = vpack.c.bf16 %v61_v43, %v60_v42  ;;  %v62_v48 = vld [vmem:[%s3898_s2 + $0x70] sm:$0xff]  ;;  %v66_v51 = vld [vmem:[%s3899_s0 + $0x8] sm:$0xff] }
   0xc   :  { %v2684_v47 = vpack.c.bf16 %v47_v45, %v46_v44  ;;  %v63_v49 = vld [vmem:[%s3898_s2 + $0x78] sm:$0xff]  ;;  %v67_v52 = vld [vmem:[%s3899_s0 + $0x10] sm:$0xff]  ;;  %v69_v54 = vld [vmem:[%s3899_s0 + $0x20] sm:$0xff] }
   0xd   :  { %2667 = vmatpush3.bf16.msra.mxu0 %v2664_v16  ;;  %2696 = vmatpush3.bf16.msra.mxu1 %v3268_v21  ;;  %v3345_v50 = vpack.c.bf16 %v63_v49, %v62_v48  ;;  %v68_v53 = vld [vmem:[%s3899_s0 + $0x18] sm:$0xff]  ;;  %v70_v55 = vld [vmem:[%s3899_s0 + $0x28] sm:$0xff]  ;;  %v71_v56 = vld [vmem:[%s3899_s0 + $0x30] sm:$0xff] }
   0xe   :  { %2669 = vmatprep.subr.bf16.mxu0 %v2668_v22  ;;  %2697 = vmatprep.subr.bf16.mxu1 %v3163_v2  ;;  %v72_v57 = vld [vmem:[%s3899_s0 + $0x38] sm:$0xff]  ;;  %v3412_v58 = vld [vmem:[%s3900_s3] ss:$0 sm:$0xff]  ;;  %v793_v37 = vld [vmem:[%s3901_s4 + $0x10] sm:$0xff] }
   0xf   :  { %v794_v38 = vld [vmem:[%s3901_s4 + $0x18] sm:$0xff]  ;;  %v796_v42 = vld [vmem:[%s3901_s4 + $0x28] sm:$0xff]  ;;  %v797_v44 = vld [vmem:[%s3901_s4 + $0x30] sm:$0xff] }
  0x10   :  { %v2884_v39 = vpack.c.bf16 %v794_v38, %v793_v37  ;;  %v798_v45 = vld [vmem:[%s3901_s4 + $0x38] sm:$0xff]  ;;  %v800_v48 = vld [vmem:[%s3901_s4 + $0x48] sm:$0xff] }
  0x11   :  { %2671 = vmatpush3.bf16.msra.mxu0 %v2668_v22  ;;  %2699 = vmatpush3.bf16.msra.mxu1 %v3287_v28 }
  0x12   :  { %2673 = vmatprep.subr.bf16.mxu0 %v2672_v29  ;;  %2700 = vmatprep.subr.bf16.mxu1 %v3163_v2 }
  0x15   :  { %2675 = vmatpush3.bf16.msra.mxu0 %v2672_v29  ;;  %2702 = vmatpush3.bf16.msra.mxu1 %v3303_v34 }
  0x16   :  { %2677 = vmatprep.subr.bf16.mxu0 %v2676_v35  ;;  %2703 = vmatprep.subr.bf16.mxu1 %v3163_v2 }
  0x19   :  { %2679 = vmatpush3.bf16.msra.mxu0 %v2676_v35  ;;  %2705 = vmatpush3.bf16.msra.mxu1 %v3319_v40 }
  0x1a   :  { %2681 = vmatprep.subr.bf16.mxu0 %v2680_v41  ;;  %2706 = vmatprep.subr.bf16.mxu1 %v3163_v2 }
  0x1d   :  { %2683 = vmatpush3.bf16.msra.mxu0 %v2680_v41  ;;  %2708 = vmatpush3.bf16.msra.mxu1 %v3335_v46  ;;  %v795_v41 = vld [vmem:[%s3901_s4 + $0x20] sm:$0xff] }
  0x1e   :  { %2685 = vmatprep.subr.bf16.mxu0 %v2684_v47  ;;  %2709 = vmatprep.subr.bf16.mxu1 %v3163_v2  ;;  %v2888_v43 = vpack.c.bf16 %v796_v42, %v795_v41 }
  0x21   :  { %2687 = vmatpush3.bf16.msra.mxu0 %v2684_v47  ;;  %2711 = vmatpush3.bf16.msra.mxu1 %v3345_v50  ;;  %v799_v47 = vld [vmem:[%s3901_s4 + $0x40] sm:$0xff] }
  0x22   :  { %2712 = vmatprep.subr.bf16.mxu0 %v3163_v2  ;;  %2736 = vmatprep.subr.bf16.mxu1 %v3163_v2  ;;  %v2896_v49 = vpack.c.bf16 %v800_v48, %v799_v47 }
  0x24   :  { %2006 = vmatmul.mubr.f32.vlgmr.msra.gmra.mrb[0].mxu0 %v66_v51  ;;  %2050 = vmatmul.mubr.f32.vlgmr.msra.gmra.mrb[0].mxu1 %v3165_v4  ;;  %v802_v51 = vld [vmem:[%s3901_s4 + $0x58] sm:$0xff] }
  0x25   :  { %2714 = vmatpush3.bf16.msra.mxu0 %v3237_v9  ;;  %2738 = vmatpush3.bf16.msra.mxu1 %v3237_v9 }
  0x26   :  { %2715 = vmatprep.subr.bf16.mxu0 %v3163_v2  ;;  %2739 = vmatprep.subr.bf16.mxu1 %v3163_v2 }
  0x27   :  { %2119 = vmatprep.mubr.msk.f32.mxu1 %vm3164_vm0, %v3165_v4  ;;  %2008 = vmatprep.mubr.f32.mxu0 %v67_v52 }
  0x28   :  { %2009 = vmatmul.mubr.f32.gmra.mrb[2].mxu0 %v68_v53  ;;  %v803_v53 = vld [vmem:[%s3901_s4 + $0x60] sm:$0xff] }
  0x29   :  { %2717 = vmatpush3.bf16.msra.mxu0 %v3252_v15  ;;  %2741 = vmatpush3.bf16.msra.mxu1 %v3252_v15 }
  0x2a   :  { %2718 = vmatprep.subr.bf16.mxu0 %v3163_v2  ;;  %2742 = vmatprep.subr.bf16.mxu1 %v3163_v2 }
  0x2b   :  { %2011 = vmatprep.mubr.f32.mxu0 %v69_v54  ;;  %v804_v54 = vld [vmem:[%s3901_s4 + $0x68] sm:$0xff] }
  0x2c   :  { %2012 = vmatmul.mubr.f32.gmra.mrb[4].mxu0 %v70_v55  ;;  %v2904_v55 = vpack.c.bf16 %v804_v54, %v803_v53 }
  0x2d   :  { %2720 = vmatpush3.bf16.msra.mxu0 %v3268_v21  ;;  %2744 = vmatpush3.bf16.msra.mxu1 %v3268_v21 }
  0x2e   :  { %2721 = vmatprep.subr.bf16.mxu0 %v3163_v2  ;;  %2745 = vmatprep.subr.bf16.mxu1 %v3163_v2 }
  0x2f   :  { %2014 = vmatprep.mubr.f32.mxu0 %v71_v56  ;;  %v805_v56 = vld [vmem:[%s3901_s4 + $0x70] sm:$0xff] }
  0x30   :  { %2015 = vmatmul.mubr.f32.gmra.mrb[6].mxu0 %v72_v57  ;;  %v806_v57 = vld [vmem:[%s3901_s4 + $0x78] sm:$0xff] }
  0x31   :  { %2723 = vmatpush3.bf16.msra.mxu0 %v3287_v28  ;;  %2747 = vmatpush3.bf16.msra.mxu1 %v3287_v28 }
  0x32   :  { %2724 = vmatprep.subr.bf16.mxu0 %v3163_v2  ;;  %2748 = vmatprep.subr.bf16.mxu1 %v3163_v2 }
  0x33   :  { %2084 = vmatprep.mubr.msk.f32.mxu0 %vm3164_vm0, %v3165_v4 }
  0x35   :  { %2726 = vmatpush3.bf16.msra.mxu0 %v3303_v34  ;;  %2750 = vmatpush3.bf16.msra.mxu1 %v3303_v34 }
  0x36   :  { %2727 = vmatprep.subr.bf16.mxu0 %v3163_v2  ;;  %2751 = vmatprep.subr.bf16.mxu1 %v3163_v2 }
  0x39   :  { %2729 = vmatpush3.bf16.msra.mxu0 %v3319_v40  ;;  %2753 = vmatpush3.bf16.msra.mxu1 %v3319_v40 }
  0x3a   :  { %2730 = vmatprep.subr.bf16.mxu0 %v3163_v2  ;;  %2754 = vmatprep.subr.bf16.mxu1 %v3163_v2 }
  0x3d   :  { %2732 = vmatpush3.bf16.msra.mxu0 %v3335_v46  ;;  %2756 = vmatpush3.bf16.msra.mxu1 %v3335_v46 }
  0x3e   :  { %2733 = vmatprep.subr.bf16.mxu0 %v3163_v2  ;;  %2757 = vmatprep.subr.bf16.mxu1 %v3163_v2 }
  0x41   :  { %2735 = vmatpush3.bf16.msra.mxu0 %v3345_v50  ;;  %2759 = vmatpush3.bf16.msra.mxu1 %v3345_v50 }
  0x42   :  { %2760 = vmatprep.subr.bf16.mxu0 %v3163_v2  ;;  %2784 = vmatprep.subr.bf16.mxu1 %v3163_v2 }
  0xf7   :  { %v2007_v59 = vpop.f32.mrb[0].mxu0  ;;  %v259_v60 = vpop.f32.mrb[0].mxu1 }
  0xf8   :  { %v145_v61 = vpop.f32.mrb[1].mxu0  ;;  %v2051_v62 = vpop.f32.mrb[1].mxu1  ;;  %v151_v11 = vadd.f32 %v2007_v59, %v3412_v58  ;;  %v2908_v59 = vpack.c.bf16 %v806_v57, %v805_v56 }
  0xf9   :  { %v146_v63 = vadd.f32 %v3412_v58, %v145_v61  ;;  %v808_v61 = vld [vmem:[%s3902_s5 + $0x8] sm:$0xff] }
  0xfb   :  { %v263_v0 = vadd.f32 %v259_v60, %v146_v63  ;;  %v2010_v3 = vpop.f32.mrb[2].mxu0  ;;  %v807_v60 = vld [vmem:[%s3902_s5] sm:$0xff]  ;;  %v809_v63 = vld [vmem:[%s3902_s5 + $0x10] sm:$0xff] }
  0xfc   :  { %v155_v5 = vpop.f32.mrb[3].mxu0  ;;  %v161_v23 = vadd.f32 %v2010_v3, %v3412_v58  ;;  %v3594_v62 = vpack.c.bf16 %v808_v61, %v807_v60  ;;  %v811_v3 = vld [vmem:[%s3902_s5 + $0x20] sm:$0xff] }
  0xfd   :  { %3131 = vtanh.f32 %v263_v0  ;;  %v156_v17 = vadd.f32 %v3412_v58, %v155_v5  ;;  %v810_v0 = vld [vmem:[%s3902_s5 + $0x18] sm:$0xff]  ;;  %v812_v5 = vld [vmem:[%s3902_s5 + $0x28] sm:$0xff] }
  0xff   :  { %v3436_v6 = vpop.f32.mrb[4].mxu0 }
 0x100   :  { %v3438_v7 = vpop.f32.mrb[5].mxu0 }
 0x101   :  { %v166_v29 = vadd.f32 %v3412_v58, %v3438_v7  ;;  %v813_v7 = vld [vmem:[%s3902_s5 + $0x30] sm:$0xff] }
 0x103   :  { %v3440_v8 = vpop.f32.mrb[6].mxu0 }
 0x104   :  { %v3442_v10 = vpop.f32.mrb[7].mxu0 }
 0x107   :  { %v3415_v1 = vpop.eup %3131 }
 0x108   :  { %2085 = vmatmul.mubr.f32.vlgmr.msra.gmra.mrb[8].mxu0 %v3415_v1 }
 0x109   :  { %2762 = vmatpush3.bf16.msra.mxu0 %v3237_v9  ;;  %2154 = vmatprep.mubr.msk.f32.mxu0 %vm3164_vm0, %v3165_v4 }
 0x10a   :  { %2763 = vmatprep.subr.bf16.mxu0 %v3163_v2 }
 0x10d   :  { %2765 = vmatpush3.bf16.msra.mxu0 %v3252_v15 }
 0x10e   :  { %2766 = vmatprep.subr.bf16.mxu0 %v3163_v2 }
 0x111   :  { %2768 = vmatpush3.bf16.msra.mxu0 %v3268_v21 }
 0x112   :  { %2769 = vmatprep.subr.bf16.mxu0 %v3163_v2 }
 0x115   :  { %2771 = vmatpush3.bf16.msra.mxu0 %v3287_v28 }
 0x116   :  { %2772 = vmatprep.subr.bf16.mxu0 %v3163_v2 }
 0x119   :  { %2774 = vmatpush3.bf16.msra.mxu0 %v3303_v34 }
 0x11a   :  { %2775 = vmatprep.subr.bf16.mxu0 %v3163_v2 }
 0x11d   :  { %2777 = vmatpush3.bf16.msra.mxu0 %v3319_v40 }
 0x11e   :  { %2778 = vmatprep.subr.bf16.mxu0 %v3163_v2 }
 0x121   :  { %2780 = vmatpush3.bf16.msra.mxu0 %v3335_v46 }
 0x122   :  { %2781 = vmatprep.subr.bf16.mxu0 %v3163_v2 }
 0x125   :  { %2783 = vmatpush3.bf16.msra.mxu0 %v3345_v50 }
 0x126   :  { %2808 = vmatprep.subr.bf16.mxu0 %v3163_v2 }
 0x1db   :  { %v334_v12 = vpop.f32.mrb[8].mxu0 }
 0x1dc   :  { %v338_v13 = vadd.f32 %v334_v12, %v151_v11  ;;  %v2086_v14 = vpop.f32.mrb[9].mxu0  ;;  %v814_v11 = vld [vmem:[%s3902_s5 + $0x38] sm:$0xff] }
 0x1dd   :  { %v3624_v12 = vpack.c.bf16 %v814_v11, %v813_v7  ;;  %v816_v14 = vld [vmem:[%s3902_s5 + $0x48] sm:$0xff] }
 0x1de   :  { %3133 = vtanh.f32 %v338_v13  ;;  %v815_v13 = vld [vmem:[%s3902_s5 + $0x40] sm:$0xff] }
 0x1e8   :  { %v3445_v16 = vpop.eup %3133 }
 0x1e9   :  { %2120 = vmatmul.mubr.f32.vlgmr.msra.gmra.mrb[2].mxu1 %v3445_v16 }
 0x1ea   :  { %2786 = vmatpush3.bf16.msra.mxu1 %v3237_v9  ;;  %2189 = vmatprep.mubr.msk.f32.mxu1 %vm3164_vm0, %v3165_v4 }
 0x1eb   :  { %2787 = vmatprep.subr.bf16.mxu1 %v3163_v2 }
 0x1ee   :  { %2789 = vmatpush3.bf16.msra.mxu1 %v3252_v15 }
 0x1ef   :  { %2790 = vmatprep.subr.bf16.mxu1 %v3163_v2 }
 0x1f2   :  { %2792 = vmatpush3.bf16.msra.mxu1 %v3268_v21 }
 0x1f3   :  { %2793 = vmatprep.subr.bf16.mxu1 %v3163_v2 }
 0x1f6   :  { %2795 = vmatpush3.bf16.msra.mxu1 %v3287_v28 }
 0x1f7   :  { %2796 = vmatprep.subr.bf16.mxu1 %v3163_v2 }
 0x1fa   :  { %2798 = vmatpush3.bf16.msra.mxu1 %v3303_v34 }
 0x1fb   :  { %2799 = vmatprep.subr.bf16.mxu1 %v3163_v2 }
 0x1fe   :  { %2801 = vmatpush3.bf16.msra.mxu1 %v3319_v40 }
 0x1ff   :  { %2802 = vmatprep.subr.bf16.mxu1 %v3163_v2 }
 0x202   :  { %2804 = vmatpush3.bf16.msra.mxu1 %v3335_v46 }
 0x203   :  { %2805 = vmatprep.subr.bf16.mxu1 %v3163_v2 }
 0x206   :  { %2807 = vmatpush3.bf16.msra.mxu1 %v3345_v50 }
 0x207   :  { %2832 = vmatprep.subr.bf16.mxu1 %v3163_v2 }
 0x2bc   :  { %v409_v18 = vpop.f32.mrb[2].mxu1 }
 0x2bd   :  { %v413_v19 = vadd.f32 %v409_v18, %v156_v17  ;;  %v2121_v20 = vpop.f32.mrb[3].mxu1  ;;  %v817_v17 = vld [vmem:[%s3902_s5 + $0x50] sm:$0xff]  ;;  %v818_v18 = vld [vmem:[%s3902_s5 + $0x58] sm:$0xff] }
 0x2be   :  { %v819_v20 = vld [vmem:[%s3902_s5 + $0x60] sm:$0xff] }
 0x2bf   :  { %3135 = vtanh.f32 %v413_v19  ;;  %v3644_v19 = vpack.c.bf16 %v818_v18, %v817_v17  ;;  %v1538_v17 = vld [vmem:[%s3904_s7 + $0x18] sm:$0xff] }
 0x2c9   :  { %v3467_v22 = vpop.eup %3135 }
 0x2ca   :  { %2155 = vmatmul.mubr.f32.vlgmr.msra.gmra.mrb[10].mxu0 %v3467_v22 }
 0x2cb   :  { %2810 = vmatpush3.bf16.msra.mxu0 %v3237_v9  ;;  %2224 = vmatprep.mubr.msk.f32.mxu0 %vm3164_vm0, %v3165_v4 }
 0x2cc   :  { %2811 = vmatprep.subr.bf16.mxu0 %v3163_v2 }
 0x2cf   :  { %2813 = vmatpush3.bf16.msra.mxu0 %v3252_v15 }
 0x2d0   :  { %2814 = vmatprep.subr.bf16.mxu0 %v3163_v2 }
 0x2d3   :  { %2816 = vmatpush3.bf16.msra.mxu0 %v3268_v21 }
 0x2d4   :  { %2817 = vmatprep.subr.bf16.mxu0 %v3163_v2 }
 0x2d7   :  { %2819 = vmatpush3.bf16.msra.mxu0 %v3287_v28 }
 0x2d8   :  { %2820 = vmatprep.subr.bf16.mxu0 %v3163_v2 }
 0x2db   :  { %2822 = vmatpush3.bf16.msra.mxu0 %v3303_v34 }
 0x2dc   :  { %2823 = vmatprep.subr.bf16.mxu0 %v3163_v2 }
 0x2df   :  { %2825 = vmatpush3.bf16.msra.mxu0 %v3319_v40 }
 0x2e0   :  { %2826 = vmatprep.subr.bf16.mxu0 %v3163_v2 }
 0x2e3   :  { %2828 = vmatpush3.bf16.msra.mxu0 %v3335_v46 }
 0x2e4   :  { %2829 = vmatprep.subr.bf16.mxu0 %v3163_v2 }
 0x2e7   :  { %2831 = vmatpush3.bf16.msra.mxu0 %v3345_v50 }
 0x2e8   :  { %2856 = vmatprep.subr.bf16.mxu0 %v3163_v2 }
 0x39d   :  { %v484_v24 = vpop.f32.mrb[10].mxu0 }
 0x39e   :  { %v488_v25 = vadd.f32 %v484_v24, %v161_v23  ;;  %v2156_v26 = vpop.f32.mrb[11].mxu0  ;;  %v821_v24 = vld [vmem:[%s3902_s5 + $0x70] sm:$0xff] }
 0x3a0   :  { %3137 = vtanh.f32 %v488_v25  ;;  %v822_v25 = vld [vmem:[%s3902_s5 + $0x78] sm:$0xff] }
 0x3a1   :  { %v3664_v26 = vpack.c.bf16 %v822_v25, %v821_v24  ;;  %v1543_v25 = vld [vmem:[%s3904_s7 + $0x40] sm:$0xff] }
 0x3aa   :  { %v3489_v27 = vpop.eup %3137 }
 0x3ab   :  { %2190 = vmatmul.mubr.f32.vlgmr.msra.gmra.mrb[4].mxu1 %v3489_v27 }
 0x3ac   :  { %2834 = vmatpush3.bf16.msra.mxu1 %v3237_v9  ;;  %2259 = vmatprep.mubr.msk.f32.mxu1 %vm3164_vm0, %v3165_v4 }
 0x3ad   :  { %2835 = vmatprep.subr.bf16.mxu1 %v3163_v2 }
 0x3b0   :  { %2837 = vmatpush3.bf16.msra.mxu1 %v3252_v15 }
 0x3b1   :  { %2838 = vmatprep.subr.bf16.mxu1 %v3163_v2 }
 0x3b4   :  { %2840 = vmatpush3.bf16.msra.mxu1 %v3268_v21 }
 0x3b5   :  { %2841 = vmatprep.subr.bf16.mxu1 %v3163_v2 }
 0x3b8   :  { %2843 = vmatpush3.bf16.msra.mxu1 %v3287_v28 }
 0x3b9   :  { %2844 = vmatprep.subr.bf16.mxu1 %v3163_v2 }
 0x3bc   :  { %2846 = vmatpush3.bf16.msra.mxu1 %v3303_v34 }
 0x3bd   :  { %2847 = vmatprep.subr.bf16.mxu1 %v3163_v2 }
 0x3c0   :  { %2849 = vmatpush3.bf16.msra.mxu1 %v3319_v40 }
 0x3c1   :  { %2850 = vmatprep.subr.bf16.mxu1 %v3163_v2 }
 0x3c4   :  { %2852 = vmatpush3.bf16.msra.mxu1 %v3335_v46 }
 0x3c5   :  { %2853 = vmatprep.subr.bf16.mxu1 %v3163_v2 }
 0x3c8   :  { %2855 = vmatpush3.bf16.msra.mxu1 %v3345_v50 }
 0x47e   :  { %v559_v30 = vpop.f32.mrb[4].mxu1 }
 0x47f   :  { %v563_v31 = vadd.f32 %v559_v30, %v166_v29  ;;  %v2191_v32 = vpop.f32.mrb[5].mxu1 }
 0x481   :  { %3139 = vtanh.f32 %v563_v31 }
 0x48b   :  { %v3511_v33 = vpop.eup %3139 }
 0x48c   :  { %2225 = vmatmul.mubr.f32.vlgmr.msra.gmra.mrb[12].mxu0 %v3511_v33 }
 0x48d   :  { %2858 = vmatpush3.bf16.msra.mxu0 %v3237_v9  ;;  %2294 = vmatprep.mubr.msk.f32.mxu0 %vm3164_vm0, %v3165_v4  ;;  %v791_v9 = vld [vmem:[%s3901_s4] sm:$0xff] }
 0x48e   :  { %2859 = vmatprep.subr.bf16.mxu0 %v3163_v2 }
 0x491   :  { %2861 = vmatpush3.bf16.msra.mxu0 %v3252_v15  ;;  %v792_v15 = vld [vmem:[%s3901_s4 + $0x8] sm:$0xff] }
 0x492   :  { %2862 = vmatprep.subr.bf16.mxu0 %v3163_v2 }
 0x495   :  { %2864 = vmatpush3.bf16.msra.mxu0 %v3268_v21  ;;  %v2880_v21 = vpack.c.bf16 %v792_v15, %v791_v9 }
 0x496   :  { %2865 = vmatprep.subr.bf16.mxu0 %v3163_v2 }
 0x497   :  { %2881 = vmatprep.subr.bf16.mxu1 %v2880_v21 }
 0x499   :  { %2867 = vmatpush3.bf16.msra.mxu0 %v3287_v28  ;;  %v171_v28 = vadd.f32 %v3436_v6, %v3412_v58  ;;  %v3614_v6 = vpack.c.bf16 %v812_v5, %v811_v3 }
 0x49a   :  { %2868 = vmatprep.subr.bf16.mxu0 %v3163_v2 }
 0x49d   :  { %2870 = vmatpush3.bf16.msra.mxu0 %v3303_v34 }
 0x49e   :  { %2871 = vmatprep.subr.bf16.mxu0 %v3163_v2 }
 0x4a1   :  { %2873 = vmatpush3.bf16.msra.mxu0 %v3319_v40 }
 0x4a2   :  { %2874 = vmatprep.subr.bf16.mxu0 %v3163_v2 }
 0x4a5   :  { %2876 = vmatpush3.bf16.msra.mxu0 %v3335_v46  ;;  %v2892_v46 = vpack.c.bf16 %v798_v45, %v797_v44 }
 0x4a6   :  { %2877 = vmatprep.subr.bf16.mxu0 %v3163_v2 }
 0x4a9   :  { %2879 = vmatpush3.bf16.msra.mxu0 %v3345_v50  ;;  %v801_v50 = vld [vmem:[%s3901_s4 + $0x50] sm:$0xff] }
 0x4aa   :  { %2912 = vmatprep.subr.bf16.mxu0 %v3163_v2  ;;  %v2900_v52 = vpack.c.bf16 %v802_v51, %v801_v50 }
 0x55f   :  { %v634_v34 = vpop.f32.mrb[12].mxu0 }
 0x560   :  { %v638_v35 = vadd.f32 %v634_v34, %v171_v28  ;;  %v2226_v36 = vpop.f32.mrb[13].mxu0  ;;  %v181_v34 = vadd.f32 %v3440_v8, %v3412_v58 }
 0x562   :  { %3141 = vtanh.f32 %v638_v35 }
 0x56c   :  { %v3142_v40 = vpop.eup %3141 }
 0x56d   :  { %2260 = vmatmul.mubr.f32.vlgmr.msra.gmra.mrb[6].mxu1 %v3142_v40 }
 0x56e   :  { %2883 = vmatpush3.bf16.msra.mxu1 %v2880_v21  ;;  %2329 = vmatprep.mubr.f32.mxu1 %v3415_v1  ;;  %v3604_v1 = vpack.c.bf16 %v810_v0, %v809_v63 }
 0x56f   :  { %2885 = vmatprep.subr.bf16.mxu1 %v2884_v39 }
 0x572   :  { %2887 = vmatpush3.bf16.msra.mxu1 %v2884_v39  ;;  %v3724_v39 = vld [vmem:[%s3903_s6] ss:$0 sm:$0xff] }
 0x573   :  { %2889 = vmatprep.subr.bf16.mxu1 %v2888_v43 }
 0x576   :  { %2891 = vmatpush3.bf16.msra.mxu1 %v2888_v43 }
 0x577   :  { %2893 = vmatprep.subr.bf16.mxu1 %v2892_v46 }
 0x57a   :  { %2895 = vmatpush3.bf16.msra.mxu1 %v2892_v46 }
 0x57b   :  { %2897 = vmatprep.subr.bf16.mxu1 %v2896_v49 }
 0x57e   :  { %2899 = vmatpush3.bf16.msra.mxu1 %v2896_v49 }
 0x57f   :  { %2901 = vmatprep.subr.bf16.mxu1 %v2900_v52 }
 0x582   :  { %2903 = vmatpush3.bf16.msra.mxu1 %v2900_v52 }
 0x583   :  { %2905 = vmatprep.subr.bf16.mxu1 %v2904_v55 }
 0x586   :  { %2907 = vmatpush3.bf16.msra.mxu1 %v2904_v55 }
 0x587   :  { %2909 = vmatprep.subr.bf16.mxu1 %v2908_v59 }
 0x58a   :  { %2911 = vmatpush3.bf16.msra.mxu1 %v2908_v59 }
 0x58b   :  { %2936 = vmatprep.subr.bf16.mxu1 %v3163_v2 }
 0x58d   :  { %2330 = vmatmul.mubr.f32.vlgmr.msra.gmra.mrb[8].mxu1 %v3445_v16  ;;  %v3634_v16 = vpack.c.bf16 %v816_v14, %v815_v13  ;;  %v1536_v13 = vld [vmem:[%s3904_s7 + $0x8] sm:$0xff]  ;;  %v1537_v14 = vld [vmem:[%s3904_s7 + $0x10] sm:$0xff] }
 0x58e   :  { %2332 = vmatprep.mubr.f32.mxu1 %v3467_v22  ;;  %2938 = vmatpush3.bf16.msra.mxu1 %v3594_v62  ;;  %v820_v22 = vld [vmem:[%s3902_s5 + $0x68] sm:$0xff]  ;;  %v3108_v18 = vpack.c.bf16 %v1538_v17, %v1537_v14 }
 0x58f   :  { %2939 = vmatprep.subr.bf16.mxu1 %v3163_v2  ;;  %v3654_v23 = vpack.c.bf16 %v820_v22, %v819_v20  ;;  %v1541_v22 = vld [vmem:[%s3904_s7 + $0x30] sm:$0xff] }
 0x591   :  { %2333 = vmatmul.mubr.f32.gmra.mrb[10].mxu1 %v3489_v27  ;;  %v176_v27 = vadd.f32 %v3412_v58, %v3442_v10 }
 0x592   :  { %2335 = vmatprep.mubr.f32.mxu1 %v3511_v33  ;;  %2941 = vmatpush3.bf16.msra.mxu1 %v3604_v1 }
 0x593   :  { %2942 = vmatprep.subr.bf16.mxu1 %v3163_v2 }
 0x595   :  { %2336 = vmatmul.mubr.f32.gmra.mrb[12].mxu1 %v3142_v40 }
 0x596   :  { %2944 = vmatpush3.bf16.msra.mxu1 %v3614_v6 }
 0x597   :  { %2945 = vmatprep.subr.bf16.mxu1 %v3163_v2 }
 0x59a   :  { %2947 = vmatpush3.bf16.msra.mxu1 %v3624_v12 }
 0x59b   :  { %2948 = vmatprep.subr.bf16.mxu1 %v3163_v2 }
 0x59e   :  { %2950 = vmatpush3.bf16.msra.mxu1 %v3634_v16 }
 0x59f   :  { %2951 = vmatprep.subr.bf16.mxu1 %v3163_v2 }
 0x5a2   :  { %2953 = vmatpush3.bf16.msra.mxu1 %v3644_v19 }
 0x5a3   :  { %2954 = vmatprep.subr.bf16.mxu1 %v3163_v2 }
 0x5a6   :  { %2956 = vmatpush3.bf16.msra.mxu1 %v3654_v23 }
 0x5a7   :  { %2957 = vmatprep.subr.bf16.mxu1 %v3163_v2 }
 0x5aa   :  { %2959 = vmatpush3.bf16.msra.mxu1 %v3664_v26 }
 0x5ab   :  { %2984 = vmatprep.subr.bf16.mxu1 %v3163_v2 }
 0x640   :  { %v709_v29 = vpop.f32.mrb[6].mxu1 }
 0x641   :  { %v713_v30 = vadd.f32 %v709_v29, %v176_v27  ;;  %v2261_v31 = vpop.f32.mrb[7].mxu1 }
 0x643   :  { %3143 = vtanh.f32 %v713_v30 }
 0x64d   :  { %v3144_v32 = vpop.eup %3143 }
 0x64e   :  { %2295 = vmatmul.mubr.f32.vlgmr.msra.gmra.mrb[14].mxu0 %v3144_v32  ;;  %2338 = vmatprep.mubr.f32.mxu1 %v3144_v32 }
 0x64f   :  { %2914 = vmatpush3.bf16.msra.mxu0 %v3594_v62  ;;  %2373 = vmatprep.mubr.msk.f32.mxu0 %vm3164_vm0, %v3165_v4 }
 0x650   :  { %2915 = vmatprep.subr.bf16.mxu0 %v3163_v2 }
 0x653   :  { %2917 = vmatpush3.bf16.msra.mxu0 %v3604_v1 }
 0x654   :  { %2918 = vmatprep.subr.bf16.mxu0 %v3163_v2 }
 0x657   :  { %2920 = vmatpush3.bf16.msra.mxu0 %v3614_v6 }
 0x658   :  { %2921 = vmatprep.subr.bf16.mxu0 %v3163_v2 }
 0x65b   :  { %2923 = vmatpush3.bf16.msra.mxu0 %v3624_v12 }
 0x65c   :  { %2924 = vmatprep.subr.bf16.mxu0 %v3163_v2 }
 0x65f   :  { %2926 = vmatpush3.bf16.msra.mxu0 %v3634_v16 }
 0x660   :  { %v3681_v10 = vpop.f32.mrb[8].mxu1  ;;  %2927 = vmatprep.subr.bf16.mxu0 %v3163_v2 }
 0x661   :  { %v904_v33 = vpop.f32.mrb[9].mxu1  ;;  %v910_v45 = vadd.f32 %v3681_v10, %v3724_v39 }
 0x662   :  { %v905_v40 = vadd.f32 %v3724_v39, %v904_v33  ;;  %v1545_v33 = vld [vmem:[%s3904_s7 + $0x50] sm:$0xff] }
 0x663   :  { %2929 = vmatpush3.bf16.msra.mxu0 %v3644_v19 }
 0x664   :  { %v3685_v9 = vpop.f32.mrb[10].mxu1  ;;  %2930 = vmatprep.subr.bf16.mxu0 %v3163_v2 }
 0x665   :  { %v3688_v15 = vpop.f32.mrb[11].mxu1  ;;  %v920_v55 = vadd.f32 %v3685_v9, %v3724_v39  ;;  %v1546_v9 = vld [vmem:[%s3904_s7 + $0x58] sm:$0xff] }
 0x666   :  { %v915_v50 = vadd.f32 %v3724_v39, %v3688_v15  ;;  %v3120_v15 = vpack.c.bf16 %v1546_v9, %v1545_v33 }
 0x667   :  { %2932 = vmatpush3.bf16.msra.mxu0 %v3654_v23 }
 0x668   :  { %v3691_v21 = vpop.f32.mrb[12].mxu1  ;;  %2933 = vmatprep.subr.bf16.mxu0 %v3163_v2 }
 0x669   :  { %v3694_v28 = vpop.f32.mrb[13].mxu1 }
 0x66a   :  { %v925_v61 = vadd.f32 %v3724_v39, %v3694_v28  ;;  %v1548_v28 = vld [vmem:[%s3904_s7 + $0x68] sm:$0xff] }
 0x66b   :  { %2935 = vmatpush3.bf16.msra.mxu0 %v3664_v26 }
 0x66c   :  { %2960 = vmatprep.subr.bf16.mxu0 %v3163_v2 }
 0x66e   :  { %2374 = vmatmul.mubr.f32.vlgmr.msra.gmra.mrb[16].mxu0 %v3165_v4 }
 0x66f   :  { %2962 = vmatpush3.bf16.msra.mxu0 %v3594_v62  ;;  %2443 = vmatprep.mubr.msk.f32.mxu0 %vm3164_vm0, %v3165_v4 }
 0x670   :  { %2963 = vmatprep.subr.bf16.mxu0 %v3163_v2 }
 0x673   :  { %2965 = vmatpush3.bf16.msra.mxu0 %v3604_v1 }
 0x674   :  { %2966 = vmatprep.subr.bf16.mxu0 %v3163_v2 }
 0x677   :  { %2968 = vmatpush3.bf16.msra.mxu0 %v3614_v6 }
 0x678   :  { %2969 = vmatprep.subr.bf16.mxu0 %v3163_v2 }
 0x67b   :  { %2971 = vmatpush3.bf16.msra.mxu0 %v3624_v12 }
 0x67c   :  { %2972 = vmatprep.subr.bf16.mxu0 %v3163_v2 }
 0x67f   :  { %2974 = vmatpush3.bf16.msra.mxu0 %v3634_v16 }
 0x680   :  { %2975 = vmatprep.subr.bf16.mxu0 %v3163_v2 }
 0x683   :  { %2977 = vmatpush3.bf16.msra.mxu0 %v3644_v19 }
 0x684   :  { %2978 = vmatprep.subr.bf16.mxu0 %v3163_v2 }
 0x687   :  { %2980 = vmatpush3.bf16.msra.mxu0 %v3654_v23 }
 0x688   :  { %2981 = vmatprep.subr.bf16.mxu0 %v3163_v2 }
 0x68b   :  { %2983 = vmatpush3.bf16.msra.mxu0 %v3664_v26 }
 0x68c   :  { %3008 = vmatprep.subr.bf16.mxu0 %v3163_v2 }
 0x721   :  { %v784_v35 = vpop.f32.mrb[14].mxu0 }
 0x722   :  { %v788_v36 = vadd.f32 %v784_v35, %v181_v34  ;;  %v2296_v37 = vpop.f32.mrb[15].mxu0  ;;  %v1549_v35 = vld [vmem:[%s3904_s7 + $0x70] sm:$0xff] }
 0x724   :  { %3145 = vtanh.f32 %v788_v36  ;;  %v1550_v36 = vld [vmem:[%s3904_s7 + $0x78] sm:$0xff] }
 0x725   :  { %v3126_v37 = vpack.c.bf16 %v1550_v36, %v1549_v35 }
 0x72e   :  { %v3146_v38 = vpop.eup %3145 }
 0x72f   :  { %2339 = vmatmul.mubr.f32.gmra.mrb[14].mxu1 %v3146_v38 }
 0x730   :  { %2408 = vmatprep.mubr.msk.f32.mxu1 %vm3164_vm0, %v3165_v4 }
 0x741   :  { %v1018_v41 = vpop.f32.mrb[16].mxu0 }
 0x742   :  { %v1022_v42 = vadd.f32 %v1018_v41, %v905_v40  ;;  %v2375_v43 = vpop.f32.mrb[17].mxu0 }
 0x744   :  { %3147 = vtanh.f32 %v1022_v42 }
 0x74e   :  { %v3148_v58 = vpop.eup %3147 }
 0x74f   :  { %2409 = vmatmul.mubr.f32.vlgmr.msra.gmra.mrb[16].mxu1 %v3148_v58  ;;  %v1635_v58 = vld [vmem:[%s3905_s8] ss:$0 sm:$0xff] }
 0x750   :  { %2986 = vmatpush3.bf16.msra.mxu1 %v3594_v62  ;;  %2478 = vmatprep.mubr.msk.f32.mxu1 %vm3164_vm0, %v3165_v4 }
 0x751   :  { %2987 = vmatprep.subr.bf16.mxu1 %v3163_v2 }
 0x754   :  { %2989 = vmatpush3.bf16.msra.mxu1 %v3604_v1 }
 0x755   :  { %2990 = vmatprep.subr.bf16.mxu1 %v3163_v2 }
 0x758   :  { %2992 = vmatpush3.bf16.msra.mxu1 %v3614_v6 }
 0x759   :  { %2993 = vmatprep.subr.bf16.mxu1 %v3163_v2 }
 0x75c   :  { %2995 = vmatpush3.bf16.msra.mxu1 %v3624_v12 }
 0x75d   :  { %2996 = vmatprep.subr.bf16.mxu1 %v3163_v2 }
 0x760   :  { %2998 = vmatpush3.bf16.msra.mxu1 %v3634_v16 }
 0x761   :  { %2999 = vmatprep.subr.bf16.mxu1 %v3163_v2 }
 0x764   :  { %3001 = vmatpush3.bf16.msra.mxu1 %v3644_v19 }
 0x765   :  { %3002 = vmatprep.subr.bf16.mxu1 %v3163_v2 }
 0x768   :  { %3004 = vmatpush3.bf16.msra.mxu1 %v3654_v23 }
 0x769   :  { %3005 = vmatprep.subr.bf16.mxu1 %v3163_v2 }
 0x76c   :  { %3007 = vmatpush3.bf16.msra.mxu1 %v3664_v26 }
 0x76d   :  { %3032 = vmatprep.subr.bf16.mxu1 %v3163_v2 }
 0x802   :  { %v3745_v8 = vpop.f32.mrb[14].mxu1 }
 0x803   :  { %v3747_v44 = vpop.f32.mrb[15].mxu1  ;;  %v940_v38 = vadd.f32 %v3745_v8, %v3724_v39 }
 0x804   :  { %v935_v29 = vadd.f32 %v3724_v39, %v3747_v44 }
 0x822   :  { %v1091_v46 = vpop.f32.mrb[16].mxu1 }
 0x823   :  { %v1095_v47 = vadd.f32 %v1091_v46, %v910_v45  ;;  %v2410_v48 = vpop.f32.mrb[17].mxu1 }
 0x825   :  { %3149 = vtanh.f32 %v1095_v47 }
 0x82f   :  { %v3150_v49 = vpop.eup %3149 }
 0x830   :  { %2444 = vmatmul.mubr.f32.vlgmr.msra.gmra.mrb[18].mxu0 %v3150_v49 }
 0x831   :  { %3010 = vmatpush3.bf16.msra.mxu0 %v3594_v62  ;;  %2513 = vmatprep.mubr.msk.f32.mxu0 %vm3164_vm0, %v3165_v4 }
 0x832   :  { %3011 = vmatprep.subr.bf16.mxu0 %v3163_v2 }
 0x835   :  { %3013 = vmatpush3.bf16.msra.mxu0 %v3604_v1 }
 0x836   :  { %3014 = vmatprep.subr.bf16.mxu0 %v3163_v2 }
 0x839   :  { %3016 = vmatpush3.bf16.msra.mxu0 %v3614_v6 }
 0x83a   :  { %3017 = vmatprep.subr.bf16.mxu0 %v3163_v2 }
 0x83d   :  { %3019 = vmatpush3.bf16.msra.mxu0 %v3624_v12 }
 0x83e   :  { %3020 = vmatprep.subr.bf16.mxu0 %v3163_v2 }
 0x841   :  { %3022 = vmatpush3.bf16.msra.mxu0 %v3634_v16 }
 0x842   :  { %3023 = vmatprep.subr.bf16.mxu0 %v3163_v2 }
 0x845   :  { %3025 = vmatpush3.bf16.msra.mxu0 %v3644_v19 }
 0x846   :  { %3026 = vmatprep.subr.bf16.mxu0 %v3163_v2 }
 0x849   :  { %3028 = vmatpush3.bf16.msra.mxu0 %v3654_v23 }
 0x84a   :  { %3029 = vmatprep.subr.bf16.mxu0 %v3163_v2 }
 0x84d   :  { %3031 = vmatpush3.bf16.msra.mxu0 %v3664_v26 }
 0x84e   :  { %3056 = vmatprep.subr.bf16.mxu0 %v3163_v2 }
 0x903   :  { %v1164_v51 = vpop.f32.mrb[18].mxu0 }
 0x904   :  { %v1168_v52 = vadd.f32 %v1164_v51, %v915_v50  ;;  %v2445_v53 = vpop.f32.mrb[19].mxu0 }
 0x906   :  { %3151 = vtanh.f32 %v1168_v52 }
 0x910   :  { %v3152_v54 = vpop.eup %3151 }
 0x911   :  { %2479 = vmatmul.mubr.f32.vlgmr.msra.gmra.mrb[18].mxu1 %v3152_v54 }
 0x912   :  { %3034 = vmatpush3.bf16.msra.mxu1 %v3594_v62  ;;  %2548 = vmatprep.mubr.msk.f32.mxu1 %vm3164_vm0, %v3165_v4 }
 0x913   :  { %3035 = vmatprep.subr.bf16.mxu1 %v3163_v2 }
 0x916   :  { %3037 = vmatpush3.bf16.msra.mxu1 %v3604_v1 }
 0x917   :  { %3038 = vmatprep.subr.bf16.mxu1 %v3163_v2 }
 0x91a   :  { %3040 = vmatpush3.bf16.msra.mxu1 %v3614_v6 }
 0x91b   :  { %3041 = vmatprep.subr.bf16.mxu1 %v3163_v2 }
 0x91e   :  { %3043 = vmatpush3.bf16.msra.mxu1 %v3624_v12 }
 0x91f   :  { %3044 = vmatprep.subr.bf16.mxu1 %v3163_v2 }
 0x922   :  { %3046 = vmatpush3.bf16.msra.mxu1 %v3634_v16 }
 0x923   :  { %3047 = vmatprep.subr.bf16.mxu1 %v3163_v2 }
 0x926   :  { %3049 = vmatpush3.bf16.msra.mxu1 %v3644_v19 }
 0x927   :  { %3050 = vmatprep.subr.bf16.mxu1 %v3163_v2 }
 0x92a   :  { %3052 = vmatpush3.bf16.msra.mxu1 %v3654_v23 }
 0x92b   :  { %3053 = vmatprep.subr.bf16.mxu1 %v3163_v2 }
 0x92e   :  { %3055 = vmatpush3.bf16.msra.mxu1 %v3664_v26 }
 0x92f   :  { %3080 = vmatprep.subr.bf16.mxu1 %v3163_v2 }
 0x9e4   :  { %v1237_v56 = vpop.f32.mrb[18].mxu1 }
 0x9e5   :  { %v1241_v57 = vadd.f32 %v1237_v56, %v920_v55  ;;  %v2480_v59 = vpop.f32.mrb[19].mxu1 }
 0x9e7   :  { %3153 = vtanh.f32 %v1241_v57 }
 0x9f1   :  { %v3154_v60 = vpop.eup %3153 }
 0x9f2   :  { %2514 = vmatmul.mubr.f32.vlgmr.msra.gmra.mrb[20].mxu0 %v3154_v60 }
 0x9f3   :  { %3058 = vmatpush3.bf16.msra.mxu0 %v3594_v62  ;;  %2583 = vmatprep.mubr.msk.f32.mxu0 %vm3164_vm0, %v3165_v4 }
 0x9f4   :  { %3059 = vmatprep.subr.bf16.mxu0 %v3163_v2 }
 0x9f7   :  { %3061 = vmatpush3.bf16.msra.mxu0 %v3604_v1 }
 0x9f8   :  { %3062 = vmatprep.subr.bf16.mxu0 %v3163_v2 }
 0x9fb   :  { %3064 = vmatpush3.bf16.msra.mxu0 %v3614_v6 }
 0x9fc   :  { %3065 = vmatprep.subr.bf16.mxu0 %v3163_v2 }
 0x9ff   :  { %3067 = vmatpush3.bf16.msra.mxu0 %v3624_v12 }
 0xa00   :  { %3068 = vmatprep.subr.bf16.mxu0 %v3163_v2 }
 0xa03   :  { %3070 = vmatpush3.bf16.msra.mxu0 %v3634_v16 }
 0xa04   :  { %3071 = vmatprep.subr.bf16.mxu0 %v3163_v2 }
 0xa07   :  { %3073 = vmatpush3.bf16.msra.mxu0 %v3644_v19 }
 0xa08   :  { %3074 = vmatprep.subr.bf16.mxu0 %v3163_v2 }
 0xa0b   :  { %3076 = vmatpush3.bf16.msra.mxu0 %v3654_v23 }
 0xa0c   :  { %3077 = vmatprep.subr.bf16.mxu0 %v3163_v2 }
 0xa0f   :  { %3079 = vmatpush3.bf16.msra.mxu0 %v3664_v26 }
 0xa10   :  { %3104 = vmatprep.subr.bf16.mxu0 %v3163_v2 }
 0xac5   :  { %v1310_v63 = vpop.f32.mrb[20].mxu0 }
 0xac6   :  { %v1314_v0 = vadd.f32 %v1310_v63, %v925_v61  ;;  %v2515_v3 = vpop.f32.mrb[21].mxu0 }
 0xac8   :  { %3155 = vtanh.f32 %v1314_v0 }
 0xad2   :  { %v3156_v5 = vpop.eup %3155 }
 0xad3   :  { %2549 = vmatmul.mubr.f32.vlgmr.msra.gmra.mrb[20].mxu1 %v3156_v5 }
 0xad4   :  { %3082 = vmatpush3.bf16.msra.mxu1 %v3594_v62  ;;  %2618 = vmatprep.mubr.msk.f32.mxu1 %vm3164_vm0, %v3165_v4  ;;  %v930_v62 = vadd.f32 %v3691_v21, %v3724_v39  ;;  %v1547_v21 = vld [vmem:[%s3904_s7 + $0x60] sm:$0xff] }
 0xad5   :  { %3083 = vmatprep.subr.bf16.mxu1 %v3163_v2  ;;  %v3123_v34 = vpack.c.bf16 %v1548_v28, %v1547_v21 }
 0xad8   :  { %3085 = vmatpush3.bf16.msra.mxu1 %v3604_v1 }
 0xad9   :  { %3086 = vmatprep.subr.bf16.mxu1 %v3163_v2 }
 0xadc   :  { %3088 = vmatpush3.bf16.msra.mxu1 %v3614_v6 }
 0xadd   :  { %3089 = vmatprep.subr.bf16.mxu1 %v3163_v2 }
 0xae0   :  { %3091 = vmatpush3.bf16.msra.mxu1 %v3624_v12  ;;  %v1535_v12 = vld [vmem:[%s3904_s7] sm:$0xff] }
 0xae1   :  { %3092 = vmatprep.subr.bf16.mxu1 %v3163_v2 }
 0xae4   :  { %3094 = vmatpush3.bf16.msra.mxu1 %v3634_v16  ;;  %v3105_v16 = vpack.c.bf16 %v1536_v13, %v1535_v12 }
 0xae5   :  { %3095 = vmatprep.subr.bf16.mxu1 %v3163_v2 }
 0xae8   :  { %3097 = vmatpush3.bf16.msra.mxu1 %v3644_v19  ;;  %v1540_v19 = vld [vmem:[%s3904_s7 + $0x28] sm:$0xff] }
 0xae9   :  { %3098 = vmatprep.subr.bf16.mxu1 %v3163_v2 }
 0xaec   :  { %3100 = vmatpush3.bf16.msra.mxu1 %v3654_v23  ;;  %v1542_v23 = vld [vmem:[%s3904_s7 + $0x38] sm:$0xff] }
 0xaed   :  { %3101 = vmatprep.subr.bf16.mxu1 %v3163_v2  ;;  %v3114_v24 = vpack.c.bf16 %v1542_v23, %v1541_v22 }
 0xaf0   :  { %3103 = vmatpush3.bf16.msra.mxu1 %v3664_v26  ;;  %v1544_v26 = vld [vmem:[%s3904_s7 + $0x48] sm:$0xff] }
 0xaf1   :  { %v3117_v27 = vpack.c.bf16 %v1544_v26, %v1543_v25 }
 0xba6   :  { %v1383_v1 = vpop.f32.mrb[20].mxu1 }
 0xba7   :  { %v1387_v6 = vadd.f32 %v1383_v1, %v930_v62  ;;  %v2550_v7 = vpop.f32.mrb[21].mxu1 }
 0xba9   :  { %3157 = vtanh.f32 %v1387_v6 }
 0xbb3   :  { %v3158_v11 = vpop.eup %3157 }
 0xbb4   :  { %2584 = vmatmul.mubr.f32.vlgmr.msra.gmra.mrb[22].mxu0 %v3158_v11 }
 0xbb5   :  { %2653 = vmatprep.mubr.msk.f32.mxu0 %vm3164_vm0, %v3165_v4  ;;  %3106 = vmatpush3.bf16.msra.mxu0 %v3105_v16  ;;  %v1539_v4 = vld [vmem:[%s3904_s7 + $0x20] sm:$0xff] }
 0xbb6   :  { %3107 = vmatprep.subr.bf16.mxu0 %v3163_v2  ;;  %v3111_v20 = vpack.c.bf16 %v1540_v19, %v1539_v4 }
 0xbb9   :  { %3109 = vmatpush3.bf16.msra.mxu0 %v3108_v18 }
 0xbba   :  { %3110 = vmatprep.subr.bf16.mxu0 %v3163_v2 }
 0xbbd   :  { %3112 = vmatpush3.bf16.msra.mxu0 %v3111_v20 }
 0xbbe   :  { %3113 = vmatprep.subr.bf16.mxu0 %v3163_v2 }
 0xbc1   :  { %3115 = vmatpush3.bf16.msra.mxu0 %v3114_v24 }
 0xbc2   :  { %3116 = vmatprep.subr.bf16.mxu0 %v3163_v2 }
 0xbc5   :  { %3118 = vmatpush3.bf16.msra.mxu0 %v3117_v27 }
 0xbc6   :  { %3119 = vmatprep.subr.bf16.mxu0 %v3163_v2 }
 0xbc9   :  { %3121 = vmatpush3.bf16.msra.mxu0 %v3120_v15 }
 0xbca   :  { %3122 = vmatprep.subr.bf16.mxu0 %v3163_v2 }
 0xbcd   :  { %3124 = vmatpush3.bf16.msra.mxu0 %v3123_v34 }
 0xbce   :  { %3125 = vmatprep.subr.bf16.mxu0 %v3163_v2 }
 0xbd1   :  { %3127 = vmatpush3.bf16.msra.mxu0 %v3126_v37 }
 0xc87   :  { %v1456_v30 = vpop.f32.mrb[22].mxu0 }
 0xc88   :  { %v1460_v31 = vadd.f32 %v1456_v30, %v935_v29  ;;  %v2585_v32 = vpop.f32.mrb[23].mxu0 }
 0xc8a   :  { %3159 = vtanh.f32 %v1460_v31 }
 0xc94   :  { %v3160_v10 = vpop.eup %3159 }
 0xc95   :  { %2619 = vmatmul.mubr.f32.vlgmr.msra.gmra.mrb[22].mxu1 %v3160_v10 }
 0xd68   :  { %v1529_v40 = vpop.f32.mrb[22].mxu1 }
 0xd69   :  { %v1533_v41 = vadd.f32 %v1529_v40, %v940_v38  ;;  %v2620_v42 = vpop.f32.mrb[23].mxu1 }
 0xd6b   :  { %3161 = vtanh.f32 %v1533_v41 }
 0xd75   :  { %v3162_v43 = vpop.eup %3161 }
 0xd76   :  { %2654 = vmatmul.mubr.f32.vlgmr.msra.gmra.mrb[24].mxu0 %v3162_v43 }
 0xe49   :  { %v1624_v44 = vpop.f32.mrb[24].mxu0 }
 0xe4a   :  { %v1625_v45 = vadd.f32 %v1635_v58, %v1624_v44  ;;  %v2655_v46 = vpop.f32.mrb[25].mxu0 }
 0xe4c   :  { %1628 = vst [vmem:[%s3906_s9] sm:$0xff] %v1625_v45 }

</bundles_post_ra>
